<compile_context>
chip_gen: v5e
topology: v5e:2x2
jax: 0.10.0
libtpu: 0.0.40
codegen_flags: <defaults>
</compile_context>

<pallas_src>
import jax
import jax.numpy as jnp
from jax.experimental import pallas as pl
from jax.experimental.pallas import tpu as pltpu


def _policy_kernel(x_ref, w1_ref, b1_ref, w2_ref, b2_ref, w3_ref, b3_ref,
                   g_ref, o_ref):
    """Whole packed MLP + segmented softmax for one batch tile, all in VMEM."""
    x = x_ref[...]  # (tile_p, R*S), lane-dense

    # Linear 1 + ReLU (block-diagonal packed weights; f32 MXU accumulate).
    h1 = jnp.dot(x, w1_ref[...], preferred_element_type=jnp.float32) + b1_ref[...]
    h1 = jnp.maximum(h1, 0.0)

    # Linear 2 + ReLU.
    h2 = jnp.dot(h1, w2_ref[...], preferred_element_type=jnp.float32) + b2_ref[...]
    h2 = jnp.maximum(h2, 0.0)

    # Linear 3 -> packed logits (tile_p, R*A); every A-lane group is one row.
    logits = jnp.dot(h2, w3_ref[...], preferred_element_type=jnp.float32) + b3_ref[...]

    # Segmented softmax over each A-lane action group.
    #  - Subtracting the per-vreg-row max is mathematically exact for softmax
    #    (any per-group constant cancels) and keeps exp() overflow-safe.
    #  - g_ref is a block-diagonal ones matrix, so e @ g gives the per-group
    #    sum already broadcast back across the group's lanes (exact segmented
    #    reduction on the otherwise-idle MXU; no cross-lane shuffles needed).
    m = jnp.max(logits, axis=-1, keepdims=True)
    e = jnp.exp(logits - m)
    denom = jnp.dot(e, g_ref[...], preferred_element_type=jnp.float32)
    r = pl.reciprocal(denom, approx=True)   # EUP slot (free)
    r = r * (2.0 - denom * r)               # one Newton step -> full f32 accuracy
    o_ref[...] = (e * r).astype(o_ref.dtype)


def _round_up(n, m):
    return ((n + m - 1) // m) * m


def _pick_tile_packed(bp):
    """Batch tile in *packed* rows (1 packed row = R original batch rows).

    - Single grid step for anything up to 1024 packed rows (8192 raw rows):
      big tiles amortise the ~0.35us/step overhead and there is nothing to
      gain from extra steps on single-TC chips.
    - Larger batches: cap at 1024 packed rows and keep >= 2 grid steps so the
      v7x megacore can shard the "parallel" grid axis across its two cores.
    """
    if bp <= 1024:
        return bp
    return min(1024, _round_up(pl.cdiv(bp, 2), 8))


@jax.jit
def policy_network_forward(x, params):
    """x: [B, state_size] (f32 or bf16) -> probs: [B, action_size] float32."""
    w1, b1, w2, b2, w3, b3 = params

    squeeze = x.ndim == 1
    if squeeze:
        x = x[None, :]

    B, S = x.shape
    H = w1.shape[1]
    A = w3.shape[1]

    # Pack R batch rows per vreg row so activations are lane-dense.
    R = max(1, 128 // S)
    B8 = _round_up(B, R)
    if B8 != B:
        # Small zero-pad only when B is not a multiple of R, so the packing
        # reshape below stays a free (contiguous) reshape.  No pad to the tile
        # multiple is ever done: partial tiles are masked by the grid itself.
        x = jnp.pad(x, ((0, B8 - B), (0, 0)))
    bp = B8 // R
    xp = x.reshape(bp, R * S)  # free: contiguous row-major reshape

    # Block-diagonal replicated weights / tiled biases (built once per call;
    # a few hundred KiB, negligible next to the batch stream).
    wdt = x.dtype if x.dtype == jnp.bfloat16 else jnp.float32
    eye = jnp.eye(R, dtype=jnp.float32)
    w1p = jnp.kron(eye, w1.astype(jnp.float32)).astype(wdt)   # (R*S, R*H)
    w2p = jnp.kron(eye, w2.astype(jnp.float32)).astype(wdt)   # (R*H, R*H)
    w3p = jnp.kron(eye, w3.astype(jnp.float32)).astype(wdt)   # (R*H, R*A)
    b1p = jnp.tile(b1.astype(jnp.float32), (1, R))             # (1, R*H)
    b2p = jnp.tile(b2.astype(jnp.float32), (1, R))             # (1, R*H)
    b3p = jnp.tile(b3.astype(jnp.float32), (1, R))              # (1, R*A)
    # Block-diagonal ones: segmented sum + broadcast over A-lane action groups.
    gmat = jnp.kron(eye, jnp.ones((A, A), jnp.float32))         # (R*A, R*A)

    tile_p = _pick_tile_packed(bp)
    grid = (pl.cdiv(bp, tile_p),)

    # Weights/biases are tiny and grid-invariant: constant index_map means
    # Pallas DMAs them once and keeps them resident across all grid steps.
    def full_spec(shape):
        return pl.BlockSpec(shape, lambda i, _s=shape: tuple(0 for _ in _s))

    out = pl.pallas_call(
        _policy_kernel,
        out_shape=jax.ShapeDtypeStruct((bp, R * A), jnp.float32),
        grid=grid,
        in_specs=[
            pl.BlockSpec((tile_p, R * S), lambda i: (i, 0)),   # x (the only streaming operand)
            full_spec((R * S, R * H)),   # w1 (block-diag)
            full_spec((1, R * H)),       # b1
            full_spec((R * H, R * H)),   # w2 (block-diag)
            full_spec((1, R * H)),       # b2
            full_spec((R * H, R * A)),   # w3 (block-diag)
            full_spec((1, R * A)),       # b3
            full_spec((R * A, R * A)),   # segmented-sum ones matrix
        ],
        out_specs=pl.BlockSpec((tile_p, R * A), lambda i: (i, 0)),
        compiler_params=pltpu.CompilerParams(
            dimension_semantics=("parallel",)),   # megacore-shardable on v7x
    )(xp, w1p, b1p, w2p, b2p, w3p, b3p, gmat)

    out = out.reshape(B8, A)[:B]   # unpack lanes -> rows (free reshape), drop pad rows
    if squeeze:
        out = out[0]
    return out


def init_policy_params(key, state_size, action_size, hidden=20):
    """Deterministic init mirroring PyTorch nn.Linear default (U[-1/sqrt(fan_in), +])."""
    def linear(key, fan_in, fan_out):
        kw, kb = jax.random.split(key)
        bound = 1.0 / jnp.sqrt(jnp.float32(fan_in))
        # stored as [in, out] so the kernel computes x @ W
        w = jax.random.uniform(kw, (fan_in, fan_out), jnp.float32, -bound, bound)
        b = jax.random.uniform(kb, (1, fan_out), jnp.float32, -bound, bound)
        return w, b

    k1, k2, k3 = jax.random.split(key, 3)
    w1, b1 = linear(k1, state_size, hidden)
    w2, b2 = linear(k2, hidden, hidden)
    w3, b3 = linear(k3, hidden, action_size)
    return (w1, b1, w2, b2, w3, b3)


def _reference_forward(x, params):
    w1, b1, w2, b2, w3, b3 = params
    h1 = jnp.maximum(x @ w1 + b1, 0.0)
    h2 = jnp.maximum(h1 @ w2 + b2, 0.0)
    logits = h2 @ w3 + b3
    return jax.nn.softmax(logits, axis=-1)


if __name__ == "__main__":
    key = jax.random.PRNGKey(0)
    kx, kx2, kp = jax.random.split(key, 3)

    state_size, action_size = 16, 4
    params = init_policy_params(kp, state_size, action_size)

    # Small canonical check (batch = 8 = one packed row).
    batch = 8
    x = jax.random.normal(kx, (batch, state_size), jnp.float32)
    out = jax.block_until_ready(policy_network_forward(x, params))
    ref = _reference_forward(x, params)
    assert out.shape == (batch, action_size)
    assert jnp.allclose(out, ref, atol=5e-4, rtol=5e-4), "mismatch vs. reference"
    assert jnp.allclose(jnp.sum(out, axis=-1), 1.0, atol=1e-4), "softmax rows must sum to 1"

    # Ragged batch (not a multiple of the pack factor) exercises the pad/unpack path.
    batch2 = 300
    x2 = jax.random.normal(kx2, (batch2, state_size), jnp.float32)
    out2 = jax.block_until_ready(policy_network_forward(x2, params))
    ref2 = _reference_forward(x2, params)
    assert out2.shape == (batch2, action_size)
    assert jnp.allclose(out2, ref2, atol=5e-4, rtol=5e-4), "ragged mismatch vs. reference"
    assert jnp.allclose(jnp.sum(out2, axis=-1), 1.0, atol=1e-4), "softmax rows must sum to 1"

    print("KERNEL_OK")
</pallas_src>

<mosaic_0001>
module attributes {stable_mosaic.version = 11 : i64} {
  func.func @_policy_kernel(%arg0: i32, %arg1: memref<1x128xf32, #tpu.memory_space<vmem>>, %arg2: memref<128x160xf32, #tpu.memory_space<vmem>>, %arg3: memref<1x160xf32, #tpu.memory_space<vmem>>, %arg4: memref<160x160xf32, #tpu.memory_space<vmem>>, %arg5: memref<1x160xf32, #tpu.memory_space<vmem>>, %arg6: memref<160x32xf32, #tpu.memory_space<vmem>>, %arg7: memref<1x32xf32, #tpu.memory_space<vmem>>, %arg8: memref<32x32xf32, #tpu.memory_space<vmem>>, %arg9: memref<1x32xf32, #tpu.memory_space<vmem>>) attributes {dimension_semantics = [#tpu.dimension_semantics<parallel>], iteration_bounds = array<i64: 1>, scalar_prefetch = 0 : i64, scratch_operands = 0 : i64, tpu.core_type = #tpu.core_type<tc>, window_params = [{transform_indices = @transform_0, window_bounds = array<i64: 1, 128>}, {pipeline_mode = #tpu.pipeline_mode<synchronous>, transform_indices = @transform_1, window_bounds = array<i64: 128, 160>}, {pipeline_mode = #tpu.pipeline_mode<synchronous>, transform_indices = @transform_2, window_bounds = array<i64: 1, 160>}, {pipeline_mode = #tpu.pipeline_mode<synchronous>, transform_indices = @transform_3, window_bounds = array<i64: 160, 160>}, {pipeline_mode = #tpu.pipeline_mode<synchronous>, transform_indices = @transform_4, window_bounds = array<i64: 1, 160>}, {pipeline_mode = #tpu.pipeline_mode<synchronous>, transform_indices = @transform_5, window_bounds = array<i64: 160, 32>}, {pipeline_mode = #tpu.pipeline_mode<synchronous>, transform_indices = @transform_6, window_bounds = array<i64: 1, 32>}, {pipeline_mode = #tpu.pipeline_mode<synchronous>, transform_indices = @transform_7, window_bounds = array<i64: 32, 32>}, {transform_indices = @transform_8, window_bounds = array<i64: 1, 32>}]} {
    %c0 = arith.constant 0 : index
    %c0_0 = arith.constant 0 : index
    %0 = vector.load %arg1[%c0, %c0_0] : memref<1x128xf32, #tpu.memory_space<vmem>>, vector<1x128xf32>
    %c0_1 = arith.constant 0 : index
    %c0_2 = arith.constant 0 : index
    %1 = vector.load %arg2[%c0_1, %c0_2] : memref<128x160xf32, #tpu.memory_space<vmem>>, vector<128x160xf32>
    %cst = arith.constant dense<0.000000e+00> : vector<1x160xf32>
    %2 = tpu.matmul %0, %1, %cst {dimension_numbers = #tpu.dot_dimension_numbers<[1], [0], [0], [1], [0, 0, 1, 1], [], []>} : vector<1x128xf32>, vector<128x160xf32>, vector<1x160xf32> -> vector<1x160xf32>
    %c0_3 = arith.constant 0 : index
    %c0_4 = arith.constant 0 : index
    %3 = vector.load %arg3[%c0_3, %c0_4] : memref<1x160xf32, #tpu.memory_space<vmem>>, vector<1x160xf32>
    %4 = arith.addf %2, %3 : vector<1x160xf32>
    %cst_5 = arith.constant 0.000000e+00 : f32
    %5 = vector.broadcast %cst_5 : f32 to vector<1x160xf32>
    %6 = arith.maximumf %4, %5 : vector<1x160xf32>
    %c0_6 = arith.constant 0 : index
    %c0_7 = arith.constant 0 : index
    %7 = vector.load %arg4[%c0_6, %c0_7] : memref<160x160xf32, #tpu.memory_space<vmem>>, vector<160x160xf32>
    %cst_8 = arith.constant dense<0.000000e+00> : vector<1x160xf32>
    %8 = tpu.matmul %6, %7, %cst_8 {dimension_numbers = #tpu.dot_dimension_numbers<[1], [0], [0], [1], [0, 0, 1, 1], [], []>} : vector<1x160xf32>, vector<160x160xf32>, vector<1x160xf32> -> vector<1x160xf32>
    %c0_9 = arith.constant 0 : index
    %c0_10 = arith.constant 0 : index
    %9 = vector.load %arg5[%c0_9, %c0_10] : memref<1x160xf32, #tpu.memory_space<vmem>>, vector<1x160xf32>
    %10 = arith.addf %8, %9 : vector<1x160xf32>
    %cst_11 = arith.constant 0.000000e+00 : f32
    %11 = vector.broadcast %cst_11 : f32 to vector<1x160xf32>
    %12 = arith.maximumf %10, %11 : vector<1x160xf32>
    %c0_12 = arith.constant 0 : index
    %c0_13 = arith.constant 0 : index
    %13 = vector.load %arg6[%c0_12, %c0_13] : memref<160x32xf32, #tpu.memory_space<vmem>>, vector<160x32xf32>
    %cst_14 = arith.constant dense<0.000000e+00> : vector<1x32xf32>
    %14 = tpu.matmul %12, %13, %cst_14 {dimension_numbers = #tpu.dot_dimension_numbers<[1], [0], [0], [1], [0, 0, 1, 1], [], []>} : vector<1x160xf32>, vector<160x32xf32>, vector<1x32xf32> -> vector<1x32xf32>
    %c0_15 = arith.constant 0 : index
    %c0_16 = arith.constant 0 : index
    %15 = vector.load %arg7[%c0_15, %c0_16] : memref<1x32xf32, #tpu.memory_space<vmem>>, vector<1x32xf32>
    %16 = arith.addf %14, %15 : vector<1x32xf32>
    %cst_17 = arith.constant dense<0xFF800000> : vector<1xf32>
    %17 = vector.multi_reduction <maximumf>, %16, %cst_17 [1] : vector<1x32xf32> to vector<1xf32>
    %18 = vector.shape_cast %17 : vector<1xf32> to vector<1x1xf32>
    %19 = vector.broadcast %18 : vector<1x1xf32> to vector<1x32xf32>
    %20 = arith.subf %16, %19 : vector<1x32xf32>
    %21 = math.exp %20 : vector<1x32xf32>
    %c0_18 = arith.constant 0 : index
    %c0_19 = arith.constant 0 : index
    %22 = vector.load %arg8[%c0_18, %c0_19] : memref<32x32xf32, #tpu.memory_space<vmem>>, vector<32x32xf32>
    %cst_20 = arith.constant dense<0.000000e+00> : vector<1x32xf32>
    %23 = tpu.matmul %21, %22, %cst_20 {dimension_numbers = #tpu.dot_dimension_numbers<[1], [0], [0], [1], [0, 0, 1, 1], [], []>} : vector<1x32xf32>, vector<32x32xf32>, vector<1x32xf32> -> vector<1x32xf32>
    %24 = tpu.reciprocal %23 {approx = true} : vector<1x32xf32> -> vector<1x32xf32>
    %25 = arith.mulf %23, %24 : vector<1x32xf32>
    %cst_21 = arith.constant 2.000000e+00 : f32
    %26 = vector.broadcast %cst_21 : f32 to vector<1x32xf32>
    %27 = arith.subf %26, %25 : vector<1x32xf32>
    %28 = arith.mulf %24, %27 : vector<1x32xf32>
    %29 = arith.mulf %21, %28 : vector<1x32xf32>
    %c0_22 = arith.constant 0 : index
    %c0_23 = arith.constant 0 : index
    %30 = vector.load %arg9[%c0_22, %c0_23] : memref<1x32xf32, #tpu.memory_space<vmem>>, vector<1x32xf32>
    tpu.vector_store %arg9[%c0_22, %c0_23], %29 {strides = array<i32>} : memref<1x32xf32, #tpu.memory_space<vmem>>, vector<1x32xf32>,
    return
  }
  func.func @transform_0(%arg0: i32) -> (i32, i32) {
    %c0_i32 = arith.constant 0 : i32
    %c0_i32_0 = arith.constant 0 : i32
    return %arg0, %c0_i32 : i32, i32
  }
  func.func @transform_1(%arg0: i32) -> (i32, i32) {
    %c0_i32 = arith.constant 0 : i32
    %c0_i32_0 = arith.constant 0 : i32
    %c0_i32_1 = arith.constant 0 : i32
    return %c0_i32, %c0_i32_0 : i32, i32
  }
  func.func @transform_2(%arg0: i32) -> (i32, i32) {
    %c0_i32 = arith.constant 0 : i32
    %c0_i32_0 = arith.constant 0 : i32
    %c0_i32_1 = arith.constant 0 : i32
    return %c0_i32, %c0_i32_0 : i32, i32
  }
  func.func @transform_3(%arg0: i32) -> (i32, i32) {
    %c0_i32 = arith.constant 0 : i32
    %c0_i32_0 = arith.constant 0 : i32
    %c0_i32_1 = arith.constant 0 : i32
    return %c0_i32, %c0_i32_0 : i32, i32
  }
  func.func @transform_4(%arg0: i32) -> (i32, i32) {
    %c0_i32 = arith.constant 0 : i32
    %c0_i32_0 = arith.constant 0 : i32
    %c0_i32_1 = arith.constant 0 : i32
    return %c0_i32, %c0_i32_0 : i32, i32
  }
  func.func @transform_5(%arg0: i32) -> (i32, i32) {
    %c0_i32 = arith.constant 0 : i32
    %c0_i32_0 = arith.constant 0 : i32
    %c0_i32_1 = arith.constant 0 : i32
    return %c0_i32, %c0_i32_0 : i32, i32
  }
  func.func @transform_6(%arg0: i32) -> (i32, i32) {
    %c0_i32 = arith.constant 0 : i32
    %c0_i32_0 = arith.constant 0 : i32
    %c0_i32_1 = arith.constant 0 : i32
    return %c0_i32, %c0_i32_0 : i32, i32
  }
  func.func @transform_7(%arg0: i32) -> (i32, i32) {
    %c0_i32 = arith.constant 0 : i32
    %c0_i32_0 = arith.constant 0 : i32
    %c0_i32_1 = arith.constant 0 : i32
    return %c0_i32, %c0_i32_0 : i32, i32
  }
  func.func @transform_8(%arg0: i32) -> (i32, i32) {
    %c0_i32 = arith.constant 0 : i32
    %c0_i32_0 = arith.constant 0 : i32
    return %arg0, %c0_i32 : i32, i32
  }
}

</mosaic_0001>

<bundles_post_ra>
// kernel: policy_network_forward.1
= control target key start
LH: loop header
LB: loop body
LE: loop exit
PB: predicated region body
PF: predicated region fallthrough
CT: control target
= control target key end

     0   :  { %vm156_vm0 = vcmask 261120   ;;  %vm306_vm1 = vcmask 253952   ;;  %s712_s1 = inlined_call_operand.vmem [shape: f32[128,160], index: 1, kind: input, shape index: {}]   ;;  %s713_s3 = inlined_call_operand.vmem [shape: f32[160,160], index: 3, kind: input, shape index: {}]   ;;  %s714_s0 = inlined_call_operand.vmem [shape: f32[1,128], index: 0, kind: input, shape index: {}]   ;;  %s715_s5 = inlined_call_operand.vmem [shape: f32[160,32], index: 5, kind: input, shape index: {}]   ;;  %s716_s2 = inlined_call_operand.vmem [shape: f32[1,160], index: 2, kind: input, shape index: {}]   ;;  %s717_s4 = inlined_call_operand.vmem [shape: f32[1,160], index: 4, kind: input, shape index: {}]   ;;  %s718_s6 = inlined_call_operand.vmem [shape: f32[1,32], index: 6, kind: input, shape index: {}]   ;;  %s719_s7 = inlined_call_operand.vmem [shape: f32[32,32], index: 7, kind: input, shape index: {}]   ;;  %s720_s8 = inlined_call_operand.vmem [shape: f32[1,32], index: 8, kind: output, shape index: {}]  }
   0x1   :  { %v60_v0 = vld [vmem:[%s712_s1 + $0xf0] sm:$0xff]  ;;  %v61_v1 = vld [vmem:[%s712_s1 + $0xf8] sm:$0xff]  ;;  %v58_v2 = vld [vmem:[%s712_s1 + $0xe0] sm:$0xff] }
   0x2   :  { %68 = vmatpush.msra.mxu0 %v60_v0  ;;  %88 = vmatpush.msra.mxu1 %v61_v1  ;;  %v59_v3 = vld [vmem:[%s712_s1 + $0xe8] sm:$0xff]  ;;  %v56_v4 = vld [vmem:[%s712_s1 + $0xd0] sm:$0xff]  ;;  %v57_v5 = vld [vmem:[%s712_s1 + $0xd8] sm:$0xff] }
   0x3   :  { %v54_v6 = vld [vmem:[%s712_s1 + $0xc0] sm:$0xff]  ;;  %v55_v7 = vld [vmem:[%s712_s1 + $0xc8] sm:$0xff]  ;;  %v52_v8 = vld [vmem:[%s712_s1 + $0xb0] sm:$0xff] }
   0x4   :  { %69 = vmatpush.msra.mxu0 %v58_v2  ;;  %89 = vmatpush.msra.mxu1 %v59_v3  ;;  %v53_v9 = vld [vmem:[%s712_s1 + $0xb8] sm:$0xff]  ;;  %v50_v10 = vld [vmem:[%s712_s1 + $0xa0] sm:$0xff]  ;;  %v51_v11 = vld [vmem:[%s712_s1 + $0xa8] sm:$0xff] }
   0x5   :  { %v48_v12 = vld [vmem:[%s712_s1 + $0x90] sm:$0xff]  ;;  %v49_v13 = vld [vmem:[%s712_s1 + $0x98] sm:$0xff]  ;;  %v138_v16 = vld [vmem:[%s713_s3 + $0xe0] sm:$0xff] }
   0x6   :  { %70 = vmatpush.msra.mxu0 %v56_v4  ;;  %90 = vmatpush.msra.mxu1 %v57_v5  ;;  %v140_v14 = vld [vmem:[%s713_s3 + $0xf0] sm:$0xff]  ;;  %v46_v17 = vld [vmem:[%s712_s1 + $0x80] sm:$0xff]  ;;  %v47_v18 = vld [vmem:[%s712_s1 + $0x88] sm:$0xff] }
   0x7   :  { %v148_v15 = vld [vmem:[%s713_s3 + $0x130] sm:$0xff]  ;;  %160 = vmatpush.msra.mxu2 %v140_v14  ;;  %v146_v19 = vld [vmem:[%s713_s3 + $0x120] sm:$0xff]  ;;  %v45_v23 = vld [vmem:[%s712_s1 + $0x78] sm:$0xff] }
   0x8   :  { %71 = vmatpush.msra.mxu0 %v54_v6  ;;  %91 = vmatpush.msra.mxu1 %v55_v7  ;;  %v136_v20 = vld [vmem:[%s713_s3 + $0xd0] sm:$0xff]  ;;  %v134_v24 = vld [vmem:[%s713_s3 + $0xc0] sm:$0xff]  ;;  %v43_v27 = vld [vmem:[%s712_s1 + $0x68] sm:$0xff] }
   0x9   :  { %192 = vmatpush.msra.mxu3 %v148_v15  ;;  %v144_v21 = vld [vmem:[%s713_s3 + $0x110] sm:$0xff]  ;;  %161 = vmatpush.msra.mxu2 %v138_v16  ;;  %v142_v25 = vld [vmem:[%s713_s3 + $0x100] sm:$0xff]  ;;  %v141_v29 = vld [vmem:[%s713_s3 + $0xf8] sm:$0xff] }
   0xa   :  { %72 = vmatpush.msra.mxu0 %v52_v8  ;;  %92 = vmatpush.msra.mxu1 %v53_v9  ;;  %v44_v22 = vld [vmem:[%s712_s1 + $0x70] sm:$0xff]  ;;  %v42_v26 = vld [vmem:[%s712_s1 + $0x60] sm:$0xff]  ;;  %v41_v31 = vld [vmem:[%s712_s1 + $0x58] sm:$0xff] }
   0xb   :  { %193 = vmatpush.msra.mxu3 %v146_v19  ;;  %162 = vmatpush.msra.mxu2 %v136_v20  ;;  %v132_v28 = vld [vmem:[%s713_s3 + $0xb0] sm:$0xff]  ;;  %v130_v32 = vld [vmem:[%s713_s3 + $0xa0] sm:$0xff]  ;;  %v139_v33 = vld [vmem:[%s713_s3 + $0xe8] sm:$0xff] }
   0xc   :  { %73 = vmatpush.msra.mxu0 %v50_v10  ;;  %93 = vmatpush.msra.mxu1 %v51_v11  ;;  %v40_v30 = vld [vmem:[%s712_s1 + $0x50] sm:$0xff]  ;;  %v38_v34 = vld [vmem:[%s712_s1 + $0x40] sm:$0xff]  ;;  %v39_v35 = vld [vmem:[%s712_s1 + $0x48] sm:$0xff] }
   0xd   :  { %194 = vmatpush.msra.mxu3 %v144_v21  ;;  %163 = vmatpush.msra.mxu2 %v134_v24  ;;  %v128_v36 = vld [vmem:[%s713_s3 + $0x90] sm:$0xff]  ;;  %v137_v37 = vld [vmem:[%s713_s3 + $0xd8] sm:$0xff]  ;;  %v126_v40 = vld [vmem:[%s713_s3 + $0x80] sm:$0xff] }
   0xe   :  { %74 = vmatpush.msra.mxu0 %v48_v12  ;;  %94 = vmatpush.msra.mxu1 %v49_v13  ;;  %v36_v38 = vld [vmem:[%s712_s1 + $0x30] sm:$0xff]  ;;  %v37_v39 = vld [vmem:[%s712_s1 + $0x38] sm:$0xff]  ;;  %v135_v41 = vld [vmem:[%s713_s3 + $0xc8] sm:$0xff] }
   0xf   :  { %195 = vmatpush.msra.mxu3 %v142_v25  ;;  %164 = vmatpush.msra.mxu2 %v132_v28  ;;  %v34_v42 = vld [vmem:[%s712_s1 + $0x20] sm:$0xff]  ;;  %v35_v43 = vld [vmem:[%s712_s1 + $0x28] sm:$0xff]  ;;  %v124_v44 = vld [vmem:[%s713_s3 + $0x70] sm:$0xff] }
  0x10   :  { %75 = vmatpush.msra.mxu0 %v46_v17  ;;  %95 = vmatpush.msra.mxu1 %v47_v18  ;;  %v133_v45 = vld [vmem:[%s713_s3 + $0xb8] sm:$0xff]  ;;  %v32_v46 = vld [vmem:[%s712_s1 + $0x10] sm:$0xff]  ;;  %v122_v48 = vld [vmem:[%s713_s3 + $0x60] sm:$0xff] }
  0x11   :  { %200 = vmatpush.msrb.mxu3 %v141_v29  ;;  %165 = vmatpush.msra.mxu2 %v130_v32  ;;  %v33_v47 = vld [vmem:[%s712_s1 + $0x18] sm:$0xff]  ;;  %v131_v49 = vld [vmem:[%s713_s3 + $0xa8] sm:$0xff]  ;;  %v30_v50 = vld [vmem:[%s712_s1] sm:$0xff] }
  0x12   :  { %76 = vmatpush.msra.mxu0 %v44_v22  ;;  %96 = vmatpush.msra.mxu1 %v45_v23  ;;  %v31_v51 = vld [vmem:[%s712_s1 + $0x8] sm:$0xff]  ;;  %v29_v52 = vld [vmem:[%s714_s0] sm:$0x1]  ;;  %v120_v53 = vld [vmem:[%s713_s3 + $0x50] sm:$0xff] }
  0x13   :  { %201 = vmatpush.msrb.mxu3 %v139_v33  ;;  %166 = vmatpush.msra.mxu2 %v128_v36  ;;  %v129_v54 = vld [vmem:[%s713_s3 + $0x98] sm:$0xff]  ;;  %v118_v56 = vld [vmem:[%s713_s3 + $0x40] sm:$0xff]  ;;  %v127_v57 = vld [vmem:[%s713_s3 + $0x88] sm:$0xff] }
  0x14   :  { %77 = vmatpush.msra.mxu0 %v42_v26  ;;  %97 = vmatpush.msra.mxu1 %v43_v27  ;;  %v149_v55 = vld [vmem:[%s713_s3 + $0x138] sm:$0xff]  ;;  %v116_v58 = vld [vmem:[%s713_s3 + $0x30] sm:$0xff]  ;;  %v114_v60 = vld [vmem:[%s713_s3 + $0x20] sm:$0xff] }
  0x15   :  { %202 = vmatpush.msrb.mxu3 %v137_v37  ;;  %167 = vmatpush.msra.mxu2 %v126_v40  ;;  %v125_v59 = vld [vmem:[%s713_s3 + $0x78] sm:$0xff]  ;;  %v123_v61 = vld [vmem:[%s713_s3 + $0x68] sm:$0xff]  ;;  %v112_v63 = vld [vmem:[%s713_s3 + $0x10] sm:$0xff] }
  0x16   :  { %78 = vmatpush.msra.mxu0 %v40_v30  ;;  %98 = vmatpush.msra.mxu1 %v41_v31  ;;  %v147_v62 = vld [vmem:[%s713_s3 + $0x128] sm:$0xff]  ;;  %v121_v0 = vld [vmem:[%s713_s3 + $0x58] sm:$0xff]  ;;  %v110_v2 = vld [vmem:[%s713_s3] sm:$0xff] }
  0x17   :  { %203 = vmatpush.msrb.mxu3 %v135_v41  ;;  %168 = vmatpush.msra.mxu2 %v124_v44  ;;  %v145_v1 = vld [vmem:[%s713_s3 + $0x118] sm:$0xff]  ;;  %v119_v3 = vld [vmem:[%s713_s3 + $0x48] sm:$0xff]  ;;  %v256_v10 = vld [vmem:[%s715_s5 + $0x70] sm:$0xff] }
  0x18   :  { %79 = vmatpush.msra.mxu0 %v38_v34  ;;  %99 = vmatpush.msra.mxu1 %v39_v35  ;;  %v143_v4 = vld [vmem:[%s713_s3 + $0x108] sm:$0xff]  ;;  %v117_v5 = vld [vmem:[%s713_s3 + $0x38] sm:$0xff]  ;;  %v254_v12 = vld [vmem:[%s715_s5 + $0x60] sm:$0xff] }
  0x19   :  { %204 = vmatpush.msrb.mxu3 %v133_v45  ;;  %169 = vmatpush.msra.mxu2 %v122_v48  ;;  %v115_v6 = vld [vmem:[%s713_s3 + $0x28] sm:$0xff]  ;;  %v113_v7 = vld [vmem:[%s713_s3 + $0x18] sm:$0xff]  ;;  %v252_v14 = vld [vmem:[%s715_s5 + $0x50] sm:$0xff] }
  0x1a   :  { %80 = vmatpush.msra.mxu0 %v36_v38  ;;  %100 = vmatpush.msra.mxu1 %v37_v39  ;;  %v111_v8 = vld [vmem:[%s713_s3 + $0x8] sm:$0xff]  ;;  %v257_v9 = vld [vmem:[%s715_s5 + $0x78] sm:$0xff]  ;;  %v250_v16 = vld [vmem:[%s715_s5 + $0x40] sm:$0xff] }
  0x1b   :  { %205 = vmatpush.msrb.mxu3 %v131_v49  ;;  %170 = vmatpush.msra.mxu2 %v120_v53  ;;  %v255_v11 = vld [vmem:[%s715_s5 + $0x68] sm:$0xff]  ;;  %v253_v13 = vld [vmem:[%s715_s5 + $0x58] sm:$0xff]  ;;  %v62_v17 = vld [vmem:[%s716_s2] sm:$0x3] }
  0x1c   :  { %81 = vmatpush.msra.mxu0 %v34_v42  ;;  %101 = vmatpush.msra.mxu1 %v35_v43  ;;  %v251_v15 = vld [vmem:[%s715_s5 + $0x48] sm:$0xff]  ;;  %v249_v18 = vld [vmem:[%s715_s5 + $0x38] sm:$0xff]  ;;  %v64_v19 = vperm.slane %v62_v17, 0  ;;  %v65_v20 = vperm.slane %v62_v17, 1  ;;  %v248_v27 = vld [vmem:[%s715_s5 + $0x30] sm:$0xff] }
  0x1d   :  { %206 = vmatpush.msrb.mxu3 %v129_v54  ;;  %171 = vmatpush.msra.mxu2 %v118_v56  ;;  %v247_v28 = vld [vmem:[%s715_s5 + $0x28] sm:$0xff]  ;;  %v246_v29 = vld [vmem:[%s715_s5 + $0x20] sm:$0xff]  ;;  %v245_v30 = vld [vmem:[%s715_s5 + $0x18] sm:$0xff] }
  0x1e   :  { %82 = vmatpush.msra.mxu0 %v32_v46  ;;  %102 = vmatpush.msra.mxu1 %v33_v47  ;;  %v244_v31 = vld [vmem:[%s715_s5 + $0x10] sm:$0xff]  ;;  %v243_v32 = vld [vmem:[%s715_s5 + $0x8] sm:$0xff]  ;;  %v242_v33 = vld [vmem:[%s715_s5] sm:$0xff] }
  0x1f   :  { %207 = vmatpush.msrb.mxu3 %v127_v57  ;;  %172 = vmatpush.msra.mxu2 %v116_v58  ;;  %v261_v34 = vld [vmem:[%s715_s5 + $0x98] sm:$0xff]  ;;  %v260_v35 = vld [vmem:[%s715_s5 + $0x90] sm:$0xff]  ;;  %v259_v36 = vld [vmem:[%s715_s5 + $0x88] sm:$0xff] }
  0x20   :  { %83 = vmatpush.msra.mxu0 %v30_v50  ;;  %103 = vmatpush.msra.mxu1 %v31_v51  ;;  %v258_v37 = vld [vmem:[%s715_s5 + $0x80] sm:$0xff]  ;;  %v316_v57 = vld [vmem:[%s719_s7 + $0x18] sm:$0xff]  ;;  %v315_v58 = vld [vmem:[%s719_s7 + $0x10] sm:$0xff] }
  0x21   :  { %84 = vmatmul.f32.vlgmr.msra.gmra.mxu0 %v29_v52  ;;  %104 = vmatmul.f32.vlgmr.msra.gmra.mxu1 %v29_v52  ;;  %v150_v38 = vld [vmem:[%s717_s4] sm:$0x3] }
  0x22   :  { %232 = vmatpush.msrb.mxu0 %v149_v55  ;;  %208 = vmatpush.msrb.mxu3 %v125_v59  ;;  %v152_v39 = vperm.slane %v150_v38, 0  ;;  %v153_v45 = vperm.slane %v150_v38, 1  ;;  %v262_v51 = vld [vmem:[%s718_s6] sm:$0x1]  ;;  %v314_v59 = vld [vmem:[%s719_s7 + $0x8] sm:$0xff] }
  0x23   :  { %173 = vmatpush.msra.mxu2 %v114_v60  ;;  %266 = vmatpush.msrb.mxu1 %v257_v9  ;;  %v313_v60 = vld [vmem:[%s719_s7] sm:$0xff] }
  0x24   :  { %209 = vmatpush.msrb.mxu3 %v123_v61  ;;  %233 = vmatpush.msrb.mxu0 %v147_v62 }
  0x25   :  { %174 = vmatpush.msra.mxu2 %v112_v63  ;;  %267 = vmatpush.msrb.mxu1 %v256_v10 }
  0x26   :  { %210 = vmatpush.msrb.mxu3 %v121_v0  ;;  %234 = vmatpush.msrb.mxu0 %v145_v1 }
  0x27   :  { %175 = vmatpush.msra.mxu2 %v110_v2  ;;  %268 = vmatpush.msrb.mxu1 %v255_v11 }
  0x28   :  { %211 = vmatpush.msrb.mxu3 %v119_v3  ;;  %235 = vmatpush.msrb.mxu0 %v143_v4 }
  0x29   :  { %269 = vmatpush.msrb.mxu1 %v254_v12  ;;  %298 = vmatpush.msrb.mxu2 %v261_v34 }
  0x2a   :  { %212 = vmatpush.msrb.mxu3 %v117_v5  ;;  %332 = vmatpush.msra.mxu0 %v316_v57 }
  0x2b   :  { %270 = vmatpush.msrb.mxu1 %v253_v13  ;;  %299 = vmatpush.msrb.mxu2 %v260_v35 }
  0x2c   :  { %213 = vmatpush.msrb.mxu3 %v115_v6  ;;  %333 = vmatpush.msra.mxu0 %v315_v58 }
  0x2d   :  { %271 = vmatpush.msrb.mxu1 %v252_v14  ;;  %300 = vmatpush.msrb.mxu2 %v259_v36 }
  0x2e   :  { %214 = vmatpush.msrb.mxu3 %v113_v7  ;;  %334 = vmatpush.msra.mxu0 %v314_v59 }
  0x2f   :  { %272 = vmatpush.msrb.mxu1 %v251_v15  ;;  %301 = vmatpush.msrb.mxu2 %v258_v37 }
  0x30   :  { %215 = vmatpush.msrb.mxu3 %v111_v8  ;;  %335 = vmatpush.msra.mxu0 %v313_v60 }
  0x31   :  { %273 = vmatpush.msrb.mxu1 %v250_v16 }
  0x33   :  { %274 = vmatpush.msrb.mxu1 %v249_v18 }
  0x35   :  { %275 = vmatpush.msrb.mxu1 %v248_v27 }
  0x37   :  { %276 = vmatpush.msrb.mxu1 %v247_v28 }
  0x39   :  { %277 = vmatpush.msrb.mxu1 %v246_v29 }
  0x3b   :  { %278 = vmatpush.msrb.mxu1 %v245_v30 }
  0x3d   :  { %279 = vmatpush.msrb.mxu1 %v244_v31 }
  0x3f   :  { %280 = vmatpush.msrb.mxu1 %v243_v32 }
  0x41   :  { %281 = vmatpush.msrb.mxu1 %v242_v33 }
  0x9e   :  { %v85_v21 = vpop.f32.mrf.mxu0  ;;  %v105_v22 = vpop.f32.mrf.mxu1 }
  0x9f   :  { %v86_v23 = vadd.f32 %v85_v21, %v64_v19  ;;  %v106_v24 = vadd.f32 %v105_v22, %v65_v20 }
  0xa1   :  { %v108_v25 = vmax.f32 %v86_v23, 0.0  ;;  %v109_v26 = vmax.f32 %v106_v24, 0.0 }
  0xa3   :  { %176 = vmatmul.f32.vlgmr.msra.gmra.mxu2 %v108_v25  ;;  %350 = vmatmul.msk.f32.vlgmr.msra.gmra.mxu3 %vm156_vm0, %v109_v26 }
  0xa4   :  { %351 = vmatmul.msk.f32.vlgmr.msrb.gmra.mxu0 %vm156_vm0, %v109_v26 }
  0xab   :  { %216 = vmatmul.f32.vlgmr.msrb.gmra.mxu3 %v108_v25 }
 0x121   :  { %v237_v48 = vpop.f32.mrf.mxu0 }
 0x126   :  { %v177_v40 = vpop.f32.mrf.mxu2  ;;  %v197_v41 = vpop.f32.mrf.mxu3 }
 0x127   :  { %v178_v42 = vadd.f32 %v177_v40, %v152_v39 }
 0x129   :  { %v198_v43 = vadd.f32 %v197_v41, %v178_v42 }
 0x12b   :  { %v240_v44 = vmax.f32 %v198_v43, 0.0 }
 0x12d   :  { %282 = vmatmul.f32.vlgmr.msrb.gmra.mxu1 %v240_v44 }
 0x12e   :  { %v217_v46 = vpop.f32.mrf.mxu3 }
 0x12f   :  { %v218_v47 = vadd.f32 %v217_v46, %v153_v45 }
 0x131   :  { %v238_v49 = vadd.f32 %v237_v48, %v218_v47 }
 0x133   :  { %v241_v50 = vmax.f32 %v238_v49, 0.0 }
 0x135   :  { %352 = vmatmul.msk.f32.vlgmr.msrb.gmra.mxu2 %vm156_vm0, %v241_v50 }
 0x1aa   :  { %v283_v52 = vpop.f32.mrf.mxu1 }
 0x1ab   :  { %v284_v53 = vadd.f32 %v283_v52, %v262_v51 }
 0x1b8   :  { %v303_v54 = vpop.f32.mrf.mxu2 }
 0x1b9   :  { %v304_v55 = vadd.f32 %v303_v54, %v284_v53 }
 0x1bb   :  { %v307_v56 = vsel %vm306_vm1, %v304_v55, -inf }
 0x1bc   :  { %308 = vmax.xlane.f32.xlu0 %v307_v56 }
 0x22f   :  { %v309_v61 = vpop.xlane.xlu0 %308 }
 0x230   :  { %v310_v62 = vsub.f32 %v304_v55, %v309_v61 }
 0x232   :  { %v311_v63 = vmul.f32 1.442695, %v310_v62 }
 0x234   :  { %354 = vpow2.f32 %v311_v63 }
 0x23a   :  { %v355_v0 = vpop.eup %354 }
 0x23b   :  { %353 = vmatmul.msk.f32.vlgmr.msra.gmra.mxu0 %vm156_vm0, %v355_v0 }
 0x2b8   :  { %v337_v1 = vpop.f32.mrf.mxu0 }
 0x2b9   :  { %356 = vrcp.f32 %v337_v1 }
 0x2bf   :  { %v357_v2 = vpop.eup %356 }
 0x2c0   :  { %v341_v3 = vmul.f32 %v357_v2, %v337_v1 }
 0x2c2   :  { %v342_v4 = vsub.f32 2.0, %v341_v3 }
 0x2c4   :  { %v343_v5 = vmul.f32 %v357_v2, %v342_v4 }
 0x2c6   :  { %v344_v6 = vmul.f32 %v355_v0, %v343_v5 }
 0x2c8   :  { %345 = vst.msk [vmem:[%s720_s8] sm:$0x1] %vm306_vm1, %v344_v6 }

</bundles_post_ra>
